<compile_context>
chip_gen: v7x
topology: tpu7x:2x2x1
jax: 0.10.0
libtpu: 0.0.40
codegen_flags: <defaults>
</compile_context>

<pallas_src>
import functools

import jax
import jax.numpy as jnp
from jax.experimental import pallas as pl
from jax.experimental.pallas import tpu as pltpu


def _round_up(x, m):
    return ((x + m - 1) // m) * m


def _cdiv(a, b):
    return (a + b - 1) // b


def _sublane(dtype):
    # VMEM tile height per dtype: 8 (4B), 16 (2B), 32 (1B).
    return max(8, 32 // jnp.dtype(dtype).itemsize)


def _vmem_budgets():
    """Returns (tile working-set budget, vmem_limit cap) per TPU generation."""
    cap = None
    try:
        cap = getattr(pltpu.get_tpu_info(), "vmem_capacity_bytes", None)
    except Exception:
        cap = None
    if cap is not None and cap >= 100 * 2**20:       # v5e / v6e: 128 MiB VMEM
        return 64 * 2**20, 100 * 2**20
    return 24 * 2**20, 48 * 2**20                    # v7x (64 MiB/TC) / unknown


def _conv1x1_bn_relu_kernel(x_ref, w_ref, b_ref, o_ref, *, compute_dtype,
                            precision):
    # x_ref: (Cin, thw)  activation tile in the INPUT dtype (lane = spatial)
    # w_ref: (Cout, Cin) BN-scale-folded conv weight      (grid-invariant)
    # b_ref: (Cout, 1)   folded BN bias, f32              (grid-invariant)
    # o_ref: (Cout, thw) output tile (lane-dense stores)
    x = x_ref[...].astype(compute_dtype)      # cast in-kernel: no extra HBM pass
    acc = jnp.dot(w_ref[...], x, precision=precision,
                  preferred_element_type=jnp.float32)
    o_ref[...] = jnp.maximum(acc + b_ref[...], 0.0).astype(o_ref.dtype)


@functools.partial(jax.jit, static_argnames=("compute_dtype", "out_dtype"))
def conv_1x1_bn(x_nchw, conv_w, bn_gamma, bn_beta, bn_mean, bn_var,
                eps=1e-5, compute_dtype=None, out_dtype=None):
    """1x1 Conv (no bias) + BatchNorm2d (running stats) + ReLU.  NCHW in/out."""
    N, Cin, H, W = x_nchw.shape
    Cout = conv_w.shape[0]
    HW = H * W

    x_dtype = jnp.dtype(x_nchw.dtype)
    cdt = jnp.dtype(compute_dtype) if compute_dtype is not None else x_dtype
    odt = jnp.dtype(out_dtype) if out_dtype is not None else x_dtype

    # ---- host-side folding (tiny, O(Cin*Cout)) -----------------------------
    scale = bn_gamma / jnp.sqrt(bn_var + eps)                       # (Cout,)
    w2d = conv_w.reshape(Cout, Cin).astype(jnp.float32)
    w_folded = (w2d * scale[:, None]).astype(cdt)                   # (Cout, Cin)
    bias = (bn_beta - bn_mean * scale).reshape(Cout, 1).astype(jnp.float32)

    # NCHW -> (N, Cin, H*W): contiguous reshape, NO dtype cast (no extra HBM pass).
    x3d = x_nchw.reshape(N, Cin, HW)

    # ---- tile sizing: generation-aware, sublane-padding-aware --------------
    tile_budget, vmem_cap = _vmem_budgets()
    cin_pad = _round_up(Cin, _sublane(x_dtype))
    cout_pad = _round_up(Cout, _sublane(odt))
    # Grid-invariant params are single-buffered (pl.Buffered(1)).
    const_bytes = (_round_up(Cout, _sublane(cdt)) * _round_up(Cin, 128)
                   * cdt.itemsize
                   + _round_up(Cout, 8) * 128 * 4)

    if HW < 128:
        thw = HW                                   # full-extent block is legal
    else:
        # Double-buffered x / out tiles; budget alone sets thw (no hard cap).
        per_col = 2 * (cin_pad * x_dtype.itemsize + cout_pad * odt.itemsize)
        max_cols = max(128, (tile_budget - const_bytes) // per_col)
        thw = min((max_cols // 128) * 128, (HW // 128) * 128)
        # Keep >= 4 total parallel tiles (when possible) so both v7x TCs work.
        if N * _cdiv(HW, thw) < 4:
            want_hw_tiles = _cdiv(4, N)
            thw = min(thw, max(128, _round_up(_cdiv(HW, want_hw_tiles), 128)))

    grid = (N, _cdiv(HW, thw))

    tile_bytes = 2 * thw * (cin_pad * x_dtype.itemsize + cout_pad * odt.itemsize)
    vmem_limit = int(min(vmem_cap,
                         max(32 * 2**20, tile_bytes + const_bytes + (4 << 20))))

    kernel = functools.partial(
        _conv1x1_bn_relu_kernel,
        compute_dtype=cdt,
        precision=(jax.lax.Precision.HIGHEST if cdt == jnp.float32 else None))

    out3d = pl.pallas_call(
        kernel,
        out_shape=jax.ShapeDtypeStruct((N, Cout, HW), odt),
        grid_spec=pltpu.PrefetchScalarGridSpec(
            num_scalar_prefetch=0,
            grid=grid,
            in_specs=[
                # Activation tile: cdiv grid, tail block masked automatically.
                pl.BlockSpec((None, Cin, thw), lambda n, j: (n, 0, j)),
                # Grid-invariant folded weight / bias: single buffer.
                pl.BlockSpec((Cout, Cin), lambda n, j: (0, 0),
                             pipeline_mode=pl.Buffered(1)),
                pl.BlockSpec((Cout, 1), lambda n, j: (0, 0),
                             pipeline_mode=pl.Buffered(1)),
            ],
            out_specs=pl.BlockSpec((None, Cout, thw), lambda n, j: (n, 0, j)),
        ),
        compiler_params=pltpu.CompilerParams(
            dimension_semantics=("parallel", "parallel"),
            vmem_limit_bytes=vmem_limit),
    )(x3d, w_folded, bias)

    # (N, Cout, H*W) -> NCHW is again a free reshape.
    return out3d.reshape(N, Cout, H, W)


if __name__ == "__main__":
    key = jax.random.PRNGKey(0)
    kx, kw, kx2 = jax.random.split(key, 3)

    N, Cin, H, W = 2, 4, 16, 16
    Cout = 8

    x = jax.random.normal(kx, (N, Cin, H, W), dtype=jnp.float32)

    # Deterministic parameters (shapes from the PyTorch module __init__).
    conv_w = jax.random.normal(kw, (Cout, Cin, 1, 1), dtype=jnp.float32) * 0.1
    bn_gamma = jnp.ones((Cout,), jnp.float32)     # BN weight init
    bn_beta = jnp.zeros((Cout,), jnp.float32)     # BN bias init
    bn_mean = jnp.zeros((Cout,), jnp.float32)     # running_mean init
    bn_var = jnp.ones((Cout,), jnp.float32)       # running_var init

    def ref_fn(xi):
        s = bn_gamma / jnp.sqrt(bn_var + 1e-5)
        r = jnp.einsum("nchw,oc->nohw", xi, conv_w.reshape(Cout, Cin),
                       precision=jax.lax.Precision.HIGHEST)
        r = r * s[None, :, None, None] + (bn_beta - bn_mean * s)[None, :, None, None]
        return jnp.maximum(r, 0.0)

    ref = ref_fn(x)

    # f32 path: exact module semantics (precision=HIGHEST on the MXU).
    out = jax.block_until_ready(
        conv_1x1_bn(x, conv_w, bn_gamma, bn_beta, bn_mean, bn_var))
    assert out.shape == (N, Cout, H, W)
    assert jnp.allclose(out, ref, atol=1e-5, rtol=1e-5), "f32 mismatch vs reference"

    # bf16-compute path: cast happens inside the kernel (no extra HBM pass).
    out_bf16c = jax.block_until_ready(
        conv_1x1_bn(x, conv_w, bn_gamma, bn_beta, bn_mean, bn_var,
                    compute_dtype=jnp.bfloat16))
    assert out_bf16c.shape == (N, Cout, H, W)
    assert jnp.allclose(out_bf16c, ref, atol=5e-2, rtol=5e-2), "bf16-compute mismatch"

    # bf16-output path: halves writeback traffic for tolerant consumers.
    out_bf16o = jax.block_until_ready(
        conv_1x1_bn(x, conv_w, bn_gamma, bn_beta, bn_mean, bn_var,
                    out_dtype=jnp.bfloat16))
    assert out_bf16o.dtype == jnp.bfloat16
    assert jnp.allclose(out_bf16o.astype(jnp.float32), ref, atol=5e-2, rtol=5e-2)

    # Non-128-divisible spatial size exercises the cdiv / masked-tail path.
    H2 = W2 = 12
    x2 = jax.random.normal(kx2, (N, Cin, H2, W2), dtype=jnp.float32)
    ref2 = ref_fn(x2)
    out2 = jax.block_until_ready(
        conv_1x1_bn(x2, conv_w, bn_gamma, bn_beta, bn_mean, bn_var))
    assert out2.shape == (N, Cout, H2, W2)
    assert jnp.allclose(out2, ref2, atol=1e-5, rtol=1e-5), "tail-block mismatch"

    print("KERNEL_OK")
</pallas_src>

<mosaic_0001>
module attributes {stable_mosaic.version = 11 : i64} {
  func.func @_conv1x1_bn_relu_kernel(%arg0: i32, %arg1: i32, %arg2: memref<1x4x128xf32, #tpu.memory_space<vmem>>, %arg3: memref<8x4xf32, #tpu.memory_space<vmem>>, %arg4: memref<8x1xf32, #tpu.memory_space<vmem>>, %arg5: memref<1x8x128xf32, #tpu.memory_space<vmem>>) attributes {dimension_semantics = [#tpu.dimension_semantics<parallel>, #tpu.dimension_semantics<parallel>], iteration_bounds = array<i64: 2, 2>, scalar_prefetch = 0 : i64, scratch_operands = 0 : i64, tpu.core_type = #tpu.core_type<tc>, window_params = [{transform_indices = @transform_0, window_bounds = array<i64: 1, 4, 128>}, {pipeline_mode = #tpu.pipeline_mode<synchronous>, transform_indices = @transform_1, window_bounds = array<i64: 8, 4>}, {pipeline_mode = #tpu.pipeline_mode<synchronous>, transform_indices = @transform_2, window_bounds = array<i64: 8, 1>}, {transform_indices = @transform_3, window_bounds = array<i64: 1, 8, 128>}]} {
    %c0 = arith.constant 0 : index
    %c0_0 = arith.constant 0 : index
    %c0_1 = arith.constant 0 : index
    %0 = vector.load %arg2[%c0, %c0_0, %c0_1] : memref<1x4x128xf32, #tpu.memory_space<vmem>>, vector<1x4x128xf32>
    %1 = vector.shape_cast %0 : vector<1x4x128xf32> to vector<4x128xf32>
    %c0_2 = arith.constant 0 : index
    %c0_3 = arith.constant 0 : index
    %2 = vector.load %arg3[%c0_2, %c0_3] : memref<8x4xf32, #tpu.memory_space<vmem>>, vector<8x4xf32>
    %cst = arith.constant dense<0.000000e+00> : vector<8x128xf32>
    %3 = tpu.matmul %2, %1, %cst {dimension_numbers = #tpu.dot_dimension_numbers<[1], [0], [0], [1], [0, 0, 1, 1], [], []>, precision = #tpu.contract_precision<fp32>} : vector<8x4xf32>, vector<4x128xf32>, vector<8x128xf32> -> vector<8x128xf32>
    %c0_4 = arith.constant 0 : index
    %c0_5 = arith.constant 0 : index
    %4 = vector.load %arg4[%c0_4, %c0_5] : memref<8x1xf32, #tpu.memory_space<vmem>>, vector<8x1xf32>
    %5 = vector.broadcast %4 : vector<8x1xf32> to vector<8x128xf32>
    %6 = arith.addf %3, %5 : vector<8x128xf32>
    %cst_6 = arith.constant 0.000000e+00 : f32
    %7 = vector.broadcast %cst_6 : f32 to vector<8x128xf32>
    %8 = arith.maximumf %6, %7 : vector<8x128xf32>
    %c0_7 = arith.constant 0 : index
    %c0_8 = arith.constant 0 : index
    %c0_9 = arith.constant 0 : index
    %9 = vector.load %arg5[%c0_7, %c0_8, %c0_9] : memref<1x8x128xf32, #tpu.memory_space<vmem>>, vector<1x8x128xf32>
    %10 = vector.shape_cast %9 : vector<1x8x128xf32> to vector<8x128xf32>
    %11 = vector.shape_cast %8 : vector<8x128xf32> to vector<1x8x128xf32>
    tpu.vector_store %arg5[%c0_7, %c0_8, %c0_9], %11 {strides = array<i32>} : memref<1x8x128xf32, #tpu.memory_space<vmem>>, vector<1x8x128xf32>,
    return
  }
  func.func @transform_0(%arg0: i32, %arg1: i32) -> (i32, i32, i32) {
    %c0_i32 = arith.constant 0 : i32
    %c0_i32_0 = arith.constant 0 : i32
    return %arg0, %c0_i32, %arg1 : i32, i32, i32
  }
  func.func @transform_1(%arg0: i32, %arg1: i32) -> (i32, i32) {
    %c0_i32 = arith.constant 0 : i32
    %c0_i32_0 = arith.constant 0 : i32
    %c0_i32_1 = arith.constant 0 : i32
    return %c0_i32, %c0_i32_0 : i32, i32
  }
  func.func @transform_2(%arg0: i32, %arg1: i32) -> (i32, i32) {
    %c0_i32 = arith.constant 0 : i32
    %c0_i32_0 = arith.constant 0 : i32
    %c0_i32_1 = arith.constant 0 : i32
    return %c0_i32, %c0_i32_0 : i32, i32
  }
  func.func @transform_3(%arg0: i32, %arg1: i32) -> (i32, i32, i32) {
    %c0_i32 = arith.constant 0 : i32
    %c0_i32_0 = arith.constant 0 : i32
    return %arg0, %c0_i32, %arg1 : i32, i32, i32
  }
}

</mosaic_0001>

<bundles_post_ra>
// kernel: conv_1x1_bn.1
= control target key start
LH: loop header
LB: loop body
LE: loop exit
PB: predicated region body
PF: predicated region fallthrough
CT: control target
= control target key end

     0   :  { %s922_s12 = smov 0   ;;  %s924_s13 = smov 0   ;;  %s989_s0 = inlined_call_operand.vmem [shape: f32[2,4,256], index: 0, kind: input, shape index: {}]   ;;  %s990_s1 = inlined_call_operand.vmem [shape: f32[8,4], index: 1, kind: input, shape index: {}]   ;;  %s991_s2 = inlined_call_operand.vmem [shape: f32[8,1], index: 2, kind: input, shape index: {}]   ;;  %s992_s3 = inlined_call_operand.vmem [shape: f32[2,8,256], index: 3, kind: output, shape index: {}]  }
   0x1   :  { %s926_s14 = smov 0   ;;  %s928_s15 = smov 0  }
   0x2   :  { %s930_s16 = smov 0  }
   0x3 LB: > { %s22_s17 = sadd.s32 1, %s889_s14  ;;  %s25_s18 = sadd.s32 1, %s893_s15  ;;  %s897_s16 = sphi %s930_s16, %s13_s16   ;;  %s893_s15 = sphi %s928_s15, %s996_s15   ;;  %s889_s14 = sphi %s926_s14, %s995_s14   ;;  %s885_s13 = sphi %s924_s13, %s994_s13   ;;  %s881_s12 = sphi %s922_s12, %s993_s12  }
   0x4   : > { %p23_p0 = scmp.ge.s32.totalorder %s22_s17, 2  ;;  %p756_p1 = scmp.ge.s32.totalorder %s897_s16, 1 }
   0x5   : > { %p156_p2 = scmp.lt.s32.totalorder %s897_s16, 5 }
   0x6   : > { %s998_s17 = smov (%p23_p0, %s22_s17), 0  ;;  %s1000_s18 = smov (!%p23_p0, %s25_s18), %s893_s15 }
   0x7   : > { %p157_p3 = pnand %p756_p1, %p156_p2  ;;  %p27_p4 = scmp.ge.s32.totalorder %s1000_s18, 2 }
   0x8   : > { %p186_p5 = scmp.lt.s32.totalorder (!%p157_p3), %s885_s13, 1  ;;  %p188_p6 = scmp.lt.s32.totalorder (!%p157_p3), %s881_s12, 1  ;;  %v203_v0 = vld [vmem:[%s990_s1] sm:$0xff] (!%p157_p3)  ;;  %v899_v1 = vmov (!%p157_p3), 0.0   ;;  %vm210_vm0 = vcmask (!%p157_p3), 31744   ;;  %vm900_vm1 = vmmov (!%p157_p3), 0  }
   0x9   : > { %s1002_s18 = smov (%p27_p4, %s1000_s18), 0  ;;  %160 = sbr.rel (%p157_p3) target bundleno = 261 (0x105), region = 32 }
   0xa   : > { %775 = vmatprep.subr.mxu1 (!%p157_p3), %v899_v1  ;;  %790 = vmatprep.subr.mxu0 (!%p157_p3), %v899_v1  ;;  %v204_v2 = vld [vmem:[%s991_s2] sm:$0xff] (!%p157_p3)  ;;  %v212_v3 = vsel (!%p157_p3), %vm210_vm0, %v203_v0, 0  ;;  %v901_v5 = vmov (!%p157_p3), 0   ;;  %vm214_vm2 = vcmask (!%p157_p3), 1043456  }
   0xb   : > { %777 = vmatprep.mubr.msk.f32.mxu1 (!%p157_p3), %vm900_vm1, %v899_v1  ;;  %792 = vmatprep.mubr.msk.f32.mxu0 (!%p157_p3), %vm900_vm1, %v899_v1  ;;  %v284_v4 = vand.u32 (!%p157_p3), 4294901760, %v212_v3 }
   0xc   : > { %858 = vset.pattern.permute.xlu0 (!%p157_p3), %v901_v5 }
   0xd   : > { %207 = vperm.xlu0 (!%p157_p3), %858, %v204_v2   ;;  %v285_v6 = vsub.f32 (!%p157_p3), %v212_v3, %v284_v4 }
   0xf   : > { %v286_v7 = vand.u32 (!%p157_p3), 4294901760, %v285_v6 }
  0x10   : > { %s1004_s13 = smov (!%p186_p5, %s885_s13), 1  ;;  %s1006_s12 = smov (!%p188_p6, %s881_s12), 1 }
  0x11   : > { %s757_s23 = sshll.u32 %s1004_s13, 1  ;;  %v287_v10 = vsub.f32 %v285_v6, %v286_v7 }
  0x12   : > { %s960_s24 = sadd.s32 %s757_s23, %s1006_s12 }
  0x13   : > { %s758_s25 = sshll.u32 %s960_s24, 2  ;;  %v288_v12 = vand.u32 4294901760, %v287_v10  ;;  %s760_s29 = sshll.u32 %s960_s24, 3 }
  0x14   : > { %s193_s28 = scalar_lea.vmem %s989_s0, %s758_s25  ;;  %s201_s5 = scalar_lea.vmem %s992_s3, %s760_s29 }
  0x15   : > { %v202_v8 = vld [vmem:[%s193_s28] sm:$0xf] }
  0x16   : > { %v216_v9 = vsel %vm214_vm2, %v202_v8, 0 }
  0x17   : > { %v219_v11 = vand.u32 4294901760, %v216_v9 }
  0x19   : > { %776 = vmatpush3.msra.mxu1 %v219_v11  ;;  %v296_v13 = vsub.f32 %v216_v9, %v219_v11  ;;  %791 = vmatpush3.msra.mxu0 %v219_v11 }
  0x1a   : > { %778 = vmatmul.mubr.f32.vlgmr.msra.gmra.mrb[0].mxu1 %v288_v12  ;;  %793 = vmatmul.mubr.f32.vlgmr.msra.gmra.mrb[0].mxu0 %v286_v7 }
  0x1b   : > { %780 = vmatprep.subr.mxu1 %v899_v1  ;;  %795 = vmatprep.subr.mxu0 %v899_v1  ;;  %v297_v14 = vand.u32 4294901760, %v296_v13 }
  0x1c   : > { %782 = vmatprep.mubr.msk.f32.mxu1 %vm900_vm1, %v899_v1  ;;  %797 = vmatprep.mubr.msk.f32.mxu0 %vm900_vm1, %v899_v1 }
  0x1d   : > { %v298_v15 = vsub.f32 %v296_v13, %v297_v14  ;;  %796 = vmatpush3.msra.mxu0 %v297_v14 }
  0x1e   : > { %800 = vmatprep.subr.mxu0 %v899_v1 }
  0x1f   : > { %v299_v16 = vand.u32 4294901760, %v298_v15 }
  0x21   : > { %781 = vmatpush3.msra.mxu1 %v299_v16 }
  0x22   : > { %783 = vmatmul.mubr.f32.vlgmr.msra.gmra.mrb[0].mxu1 %v284_v4  ;;  %798 = vmatmul.mubr.f32.vlgmr.msra.gmra.mrb[0].mxu0 %v284_v4 }
  0x23   : > { %785 = vmatprep.subr.mxu1 %v899_v1  ;;  %787 = vmatprep.mubr.msk.f32.mxu1 %vm900_vm1, %v899_v1 }
  0x24   : > { %786 = vmatpush3.msra.mxu1 %v296_v13  ;;  %801 = vmatpush3.msra.mxu0 %v219_v11 }
  0x25   : > { %802 = vmatprep.mubr.msk.f32.mxu0 %vm900_vm1, %v899_v1 }
  0x2a   : > { %788 = vmatmul.mubr.f32.vlgmr.msra.gmra.mrb[0].mxu1 %v285_v6  ;;  %803 = vmatmul.mubr.f32.vlgmr.msra.gmra.mrb[0].mxu0 %v284_v4 }
  0x8c   : > { %v208_v17 = vpop.permute.xlu0 %207 }
  0xfd   : > { %v440_v18 = vpop.f32.mrb[0].mxu1  ;;  %v660_v19 = vpop.f32.mrb[0].mxu0 }
  0xfe   : > { %v805_v20 = vadd.f32 %v440_v18, %v208_v17  ;;  %v789_v21 = vpop.f32.mrb[1].mxu1  ;;  %v804_v22 = vpop.f32.mrb[1].mxu0 }
 0x100   : > { %v806_v23 = vadd.f32 %v805_v20, %v660_v19 }
 0x102   : > { %v664_v24 = vmax.f32 %v806_v23, 0.0 }
 0x104   : > { %665 = vst [vmem:[%s201_s5] sm:$0xff] %v664_v24 }
 0x105 PF: > { %s13_s16 = sadd.s32 1, %s897_s16   ;;  %s993_s12 = smov %s889_s14 }
 0x106   : > { %p10_p7 = scmp.ge.s32.totalorder %s13_s16, 6   ;;  %s994_s13 = smov %s893_s15 }
 0x107   : > { %s995_s14 = smov %s998_s17  ;;  %s996_s15 = smov %s1002_s18 }
 0x108   :  { %12 = sbr.rel (!%p10_p7) target bundleno = 3 (0x3), region = 62 }

</bundles_post_ra>
